<compile_context>
chip_gen: v5e
topology: v5e:2x2
jax: 0.10.0
libtpu: 0.0.40
codegen_flags: <defaults>
</compile_context>

<pallas_src>
import math

import jax
import jax.numpy as jnp
from jax.experimental import pallas as pl
from jax.experimental.pallas import tpu as pltpu

SUBLANE_F32 = 8  # f32 sublane packing granularity


def _round_up(x, m):
    return (x + m - 1) // m * m


def dqn_snake_kernel(x_ref, w1_ref, b1_ref, w2_ref, b2_ref, o_ref):
    """Fused MLP tile: o = relu(x @ W1 + b1) @ W2 + b2 (all f32).

    x_ref:  (TB, D_in)   f32
    w1_ref: (D_in, H)    f32   (VMEM-resident)
    b1_ref: (1, H)       f32   (VMEM-resident)
    w2_ref: (H, D_out)   f32   (VMEM-resident, un-padded)
    b2_ref: (1, D_out)   f32   (VMEM-resident)
    o_ref:  (TB, D_out)  f32   (un-padded -> minimal HBM writeback)
    """
    # Layer 1 on the MXU, f32 accumulation; bias + ReLU on the VPU in f32
    # (safe on v5e which has no bf16 VALU).
    h = jnp.dot(x_ref[...], w1_ref[...], preferred_element_type=jnp.float32)
    h = jnp.maximum(h + b1_ref[...], 0.0)
    # Layer 2: tiny N=d_out matmul; MXU is nearly idle so f32 operands are free.
    q = jnp.dot(h, w2_ref[...], preferred_element_type=jnp.float32)
    o_ref[...] = (q + b2_ref[...]).astype(o_ref.dtype)
    # TODO(synk): if the caller only needs argmax(Q) (action selection), fuse
    # the reduction here and emit a (TB, 1) int32 output to cut writeback ~4x more.


def prepare_params(w1, b1, w2, b2):
    """One-time parameter preparation (call at init / after optimizer steps).

    All-f32 path: no padding or bf16 casting is needed anymore; only biases are
    reshaped to 2-D rows (a free bitcast in XLA).
    """
    d_in, hidden = w1.shape
    d_out = w2.shape[1]
    assert b1.shape == (hidden,)
    assert w2.shape == (hidden, d_out)
    assert b2.shape == (d_out,)
    return (w1.astype(jnp.float32),
            b1.reshape(1, hidden).astype(jnp.float32),
            w2.astype(jnp.float32),
            b2.reshape(1, d_out).astype(jnp.float32))


def dqn_snake_forward(x, params, *, block_batch=8192):
    """x: (B, D_in) f32; params: output of prepare_params. Returns (B, D_out) f32."""
    w1, b1_row, w2, b2_row = params
    batch, d_in = x.shape
    hidden = w1.shape[1]
    d_out = w2.shape[1]
    assert w1.shape == (d_in, hidden)

    x = x.astype(jnp.float32)  # no-op for f32 inputs

    # Batch tiling: TB rows per grid step; weights/biases stay VMEM-resident.
    tb = min(block_batch, _round_up(batch, SUBLANE_F32))
    # Give the second TensorCore (v7x megacore) work when the batch is big
    # enough that splitting beats the extra per-grid-step overhead.
    if batch >= 2048 and _round_up(batch, tb) // tb < 2:
        tb = _round_up((batch + 1) // 2, SUBLANE_F32)
    batch_pad = _round_up(batch, tb)
    if batch_pad != batch:
        # Only pads the remainder rows; no unconditional full-array pass.
        x = jnp.pad(x, ((0, batch_pad - batch), (0, 0)))
    grid = (batch_pad // tb,)

    flops = 2 * batch_pad * (d_in * hidden + hidden * d_out)
    bytes_accessed = (batch_pad * d_in * 4 + w1.size * 4 + b1_row.size * 4
                      + w2.size * 4 + b2_row.size * 4
                      + batch_pad * d_out * 4)

    out = pl.pallas_call(
        dqn_snake_kernel,
        out_shape=jax.ShapeDtypeStruct((batch_pad, d_out), jnp.float32),
        grid_spec=pltpu.PrefetchScalarGridSpec(
            num_scalar_prefetch=0,
            grid=grid,
            in_specs=[
                pl.BlockSpec((tb, d_in), lambda i: (i, 0)),       # x: batch tiled
                pl.BlockSpec((d_in, hidden), lambda i: (0, 0)),   # W1: resident
                pl.BlockSpec((1, hidden), lambda i: (0, 0)),      # b1: resident
                pl.BlockSpec((hidden, d_out), lambda i: (0, 0)),  # W2: resident
                pl.BlockSpec((1, d_out), lambda i: (0, 0)),       # b2: resident
            ],
            out_specs=pl.BlockSpec((tb, d_out), lambda i: (i, 0)),
        ),
        compiler_params=pltpu.CompilerParams(
            dimension_semantics=("parallel",),
            vmem_limit_bytes=32 * 1024 * 1024),
        cost_estimate=pl.CostEstimate(
            flops=flops, transcendentals=0, bytes_accessed=bytes_accessed),
    )(x, w1, b1_row, w2, b2_row)

    # Strip batch padding; output columns were never padded.
    return out[:batch]


def init_linear_params(key, fan_in, fan_out):
    """PyTorch nn.Linear default init: U(-1/sqrt(fan_in), 1/sqrt(fan_in)).
    Weight returned pre-transposed to (fan_in, fan_out)."""
    k_w, k_b = jax.random.split(key)
    bound = 1.0 / math.sqrt(fan_in)
    w = jax.random.uniform(k_w, (fan_in, fan_out), jnp.float32, -bound, bound)
    b = jax.random.uniform(k_b, (fan_out,), jnp.float32, -bound, bound)
    return w, b


def _ref_forward(x, w1, b1, w2, b2):
    """Pure-JAX f32 reference matching the PyTorch module."""
    return jnp.maximum(x @ w1 + b1, 0.0) @ w2 + b2


if __name__ == "__main__":
    # Typical snake-DQN shapes: small state vector -> 4 actions.
    input_size = 16
    hidden = 256
    output_size = 4

    key = jax.random.PRNGKey(0)
    k_x, k_l1, k_l2, k_x2 = jax.random.split(key, 4)

    w1, b1 = init_linear_params(k_l1, input_size, hidden)
    w2, b2 = init_linear_params(k_l2, hidden, output_size)
    params = prepare_params(w1, b1, w2, b2)  # hoisted, done once

    # 1) Small inference-style batch (single grid step).
    batch = 8
    x = jax.random.normal(k_x, (batch, input_size), jnp.float32)
    q_vals = jax.block_until_ready(dqn_snake_forward(x, params))
    ref = _ref_forward(x, w1, b1, w2, b2)
    assert q_vals.shape == (batch, output_size)
    assert jnp.allclose(q_vals, ref, atol=2e-2, rtol=2e-2)

    # 2) Batch not divisible by the tile: exercises multi-step grid + padding.
    batch2 = 20
    x2 = jax.random.normal(k_x2, (batch2, input_size), jnp.float32)
    q2 = jax.block_until_ready(dqn_snake_forward(x2, params, block_batch=8))
    ref2 = _ref_forward(x2, w1, b1, w2, b2)
    assert q2.shape == (batch2, output_size)
    assert jnp.allclose(q2, ref2, atol=2e-2, rtol=2e-2)

    print("KERNEL_OK")
</pallas_src>

<mosaic_0001>
module attributes {stable_mosaic.version = 11 : i64} {
  func.func @dqn_snake_kernel(%arg0: i32, %arg1: memref<8x16xf32, #tpu.memory_space<vmem>>, %arg2: memref<16x256xf32, #tpu.memory_space<vmem>>, %arg3: memref<1x256xf32, #tpu.memory_space<vmem>>, %arg4: memref<256x4xf32, #tpu.memory_space<vmem>>, %arg5: memref<1x4xf32, #tpu.memory_space<vmem>>, %arg6: memref<8x4xf32, #tpu.memory_space<vmem>>) attributes {dimension_semantics = [#tpu.dimension_semantics<parallel>], iteration_bounds = array<i64: 1>, scalar_prefetch = 0 : i64, scratch_operands = 0 : i64, tpu.core_type = #tpu.core_type<tc>, window_params = [{transform_indices = @transform_0, window_bounds = array<i64: 8, 16>}, {pipeline_mode = #tpu.pipeline_mode<synchronous>, transform_indices = @transform_1, window_bounds = array<i64: 16, 256>}, {pipeline_mode = #tpu.pipeline_mode<synchronous>, transform_indices = @transform_2, window_bounds = array<i64: 1, 256>}, {pipeline_mode = #tpu.pipeline_mode<synchronous>, transform_indices = @transform_3, window_bounds = array<i64: 256, 4>}, {pipeline_mode = #tpu.pipeline_mode<synchronous>, transform_indices = @transform_4, window_bounds = array<i64: 1, 4>}, {transform_indices = @transform_5, window_bounds = array<i64: 8, 4>}]} {
    %c0 = arith.constant 0 : index
    %c0_0 = arith.constant 0 : index
    %0 = vector.load %arg1[%c0, %c0_0] : memref<8x16xf32, #tpu.memory_space<vmem>>, vector<8x16xf32>
    %c0_1 = arith.constant 0 : index
    %c0_2 = arith.constant 0 : index
    %1 = vector.load %arg2[%c0_1, %c0_2] : memref<16x256xf32, #tpu.memory_space<vmem>>, vector<16x256xf32>
    %cst = arith.constant dense<0.000000e+00> : vector<8x256xf32>
    %2 = tpu.matmul %0, %1, %cst {dimension_numbers = #tpu.dot_dimension_numbers<[1], [0], [0], [1], [0, 0, 1, 1], [], []>} : vector<8x16xf32>, vector<16x256xf32>, vector<8x256xf32> -> vector<8x256xf32>
    %c0_3 = arith.constant 0 : index
    %c0_4 = arith.constant 0 : index
    %3 = vector.load %arg3[%c0_3, %c0_4] : memref<1x256xf32, #tpu.memory_space<vmem>>, vector<1x256xf32>
    %4 = vector.broadcast %3 : vector<1x256xf32> to vector<8x256xf32>
    %5 = arith.addf %2, %4 : vector<8x256xf32>
    %cst_5 = arith.constant 0.000000e+00 : f32
    %6 = vector.broadcast %cst_5 : f32 to vector<8x256xf32>
    %7 = arith.maximumf %5, %6 : vector<8x256xf32>
    %c0_6 = arith.constant 0 : index
    %c0_7 = arith.constant 0 : index
    %8 = vector.load %arg4[%c0_6, %c0_7] : memref<256x4xf32, #tpu.memory_space<vmem>>, vector<256x4xf32>
    %cst_8 = arith.constant dense<0.000000e+00> : vector<8x4xf32>
    %9 = tpu.matmul %7, %8, %cst_8 {dimension_numbers = #tpu.dot_dimension_numbers<[1], [0], [0], [1], [0, 0, 1, 1], [], []>} : vector<8x256xf32>, vector<256x4xf32>, vector<8x4xf32> -> vector<8x4xf32>
    %c0_9 = arith.constant 0 : index
    %c0_10 = arith.constant 0 : index
    %10 = vector.load %arg5[%c0_9, %c0_10] : memref<1x4xf32, #tpu.memory_space<vmem>>, vector<1x4xf32>
    %11 = vector.broadcast %10 : vector<1x4xf32> to vector<8x4xf32>
    %12 = arith.addf %9, %11 : vector<8x4xf32>
    %c0_11 = arith.constant 0 : index
    %c0_12 = arith.constant 0 : index
    %13 = vector.load %arg6[%c0_11, %c0_12] : memref<8x4xf32, #tpu.memory_space<vmem>>, vector<8x4xf32>
    tpu.vector_store %arg6[%c0_11, %c0_12], %12 {strides = array<i32>} : memref<8x4xf32, #tpu.memory_space<vmem>>, vector<8x4xf32>,
    return
  }
  func.func @transform_0(%arg0: i32) -> (i32, i32) {
    %c0_i32 = arith.constant 0 : i32
    %c0_i32_0 = arith.constant 0 : i32
    return %arg0, %c0_i32 : i32, i32
  }
  func.func @transform_1(%arg0: i32) -> (i32, i32) {
    %c0_i32 = arith.constant 0 : i32
    %c0_i32_0 = arith.constant 0 : i32
    %c0_i32_1 = arith.constant 0 : i32
    return %c0_i32, %c0_i32_0 : i32, i32
  }
  func.func @transform_2(%arg0: i32) -> (i32, i32) {
    %c0_i32 = arith.constant 0 : i32
    %c0_i32_0 = arith.constant 0 : i32
    %c0_i32_1 = arith.constant 0 : i32
    return %c0_i32, %c0_i32_0 : i32, i32
  }
  func.func @transform_3(%arg0: i32) -> (i32, i32) {
    %c0_i32 = arith.constant 0 : i32
    %c0_i32_0 = arith.constant 0 : i32
    %c0_i32_1 = arith.constant 0 : i32
    return %c0_i32, %c0_i32_0 : i32, i32
  }
  func.func @transform_4(%arg0: i32) -> (i32, i32) {
    %c0_i32 = arith.constant 0 : i32
    %c0_i32_0 = arith.constant 0 : i32
    %c0_i32_1 = arith.constant 0 : i32
    return %c0_i32, %c0_i32_0 : i32, i32
  }
  func.func @transform_5(%arg0: i32) -> (i32, i32) {
    %c0_i32 = arith.constant 0 : i32
    %c0_i32_0 = arith.constant 0 : i32
    return %arg0, %c0_i32 : i32, i32
  }
}

</mosaic_0001>

<bundles_post_ra>
// kernel: tpu_custom_call.1
= control target key start
LH: loop header
LB: loop body
LE: loop exit
PB: predicated region body
PF: predicated region fallthrough
CT: control target
= control target key end

     0   :  { %vm31_vm0 = vcmask 130048   ;;  %vm153_vm1 = vcmask 31744   ;;  %s312_s1 = inlined_call_operand.vmem [shape: f32[16,256], index: 1, kind: input, shape index: {}]   ;;  %s313_s0 = inlined_call_operand.vmem [shape: f32[8,16], index: 0, kind: input, shape index: {}]   ;;  %s314_s3 = inlined_call_operand.vmem [shape: f32[256,4], index: 3, kind: input, shape index: {}]   ;;  %s315_s4 = inlined_call_operand.vmem [shape: f32[1,4], index: 4, kind: input, shape index: {}]   ;;  %s316_s2 = inlined_call_operand.vmem [shape: f32[1,256], index: 2, kind: input, shape index: {}]   ;;  %s317_s5 = inlined_call_operand.vmem [shape: f32[8,4], index: 5, kind: output, shape index: {}]  }
   0x1   :  { %v23_v0 = vld [vmem:[%s312_s1 + $0x10] sm:$0xff]  ;;  %v21_v1 = vld [vmem:[%s312_s1] sm:$0xff]  ;;  %v24_v2 = vld [vmem:[%s312_s1 + $0x18] sm:$0xff] }
   0x2   :  { %49 = vmatpush.msra.mxu0 %v23_v0  ;;  %69 = vmatpush.msra.mxu1 %v24_v2  ;;  %v20_v3 = vld [vmem:[%s313_s0] sm:$0xff]  ;;  %v22_v4 = vld [vmem:[%s312_s1 + $0x8] sm:$0xff]  ;;  %v92_v5 = vld [vmem:[%s314_s3 + $0x78] sm:$0xff] }
   0x3   :  { %113 = vmatpush.msra.mxu2 %v92_v5  ;;  %v91_v6 = vld [vmem:[%s314_s3 + $0x70] sm:$0xff]  ;;  %v108_v7 = vld [vmem:[%s314_s3 + $0xf8] sm:$0xff]  ;;  %v90_v8 = vld [vmem:[%s314_s3 + $0x68] sm:$0xff] }
   0x4   :  { %50 = vmatpush.msra.mxu0 %v21_v1  ;;  %70 = vmatpush.msra.mxu1 %v22_v4  ;;  %v107_v9 = vld [vmem:[%s314_s3 + $0xf0] sm:$0xff]  ;;  %v89_v10 = vld [vmem:[%s314_s3 + $0x60] sm:$0xff]  ;;  %v106_v11 = vld [vmem:[%s314_s3 + $0xe8] sm:$0xff] }
   0x5   :  { %159 = vmatmul.msk.f32.vlgmr.msra.gmra.mxu0 %vm31_vm0, %v20_v3  ;;  %160 = vmatmul.msk.f32.vlgmr.msra.gmra.mxu1 %vm31_vm0, %v20_v3  ;;  %v88_v12 = vld [vmem:[%s314_s3 + $0x58] sm:$0xff]  ;;  %v105_v13 = vld [vmem:[%s314_s3 + $0xe0] sm:$0xff]  ;;  %v87_v14 = vld [vmem:[%s314_s3 + $0x50] sm:$0xff] }
   0x6   :  { %114 = vmatpush.msra.mxu2 %v91_v6  ;;  %133 = vmatpush.msra.mxu3 %v108_v7  ;;  %v104_v15 = vld [vmem:[%s314_s3 + $0xd8] sm:$0xff]  ;;  %v86_v16 = vld [vmem:[%s314_s3 + $0x48] sm:$0xff]  ;;  %v103_v17 = vld [vmem:[%s314_s3 + $0xd0] sm:$0xff] }
   0x7   :  { %v85_v18 = vld [vmem:[%s314_s3 + $0x40] sm:$0xff]  ;;  %v102_v19 = vld [vmem:[%s314_s3 + $0xc8] sm:$0xff]  ;;  %v84_v20 = vld [vmem:[%s314_s3 + $0x38] sm:$0xff] }
   0x8   :  { %115 = vmatpush.msra.mxu2 %v90_v8  ;;  %134 = vmatpush.msra.mxu3 %v107_v9  ;;  %v101_v21 = vld [vmem:[%s314_s3 + $0xc0] sm:$0xff]  ;;  %v83_v22 = vld [vmem:[%s314_s3 + $0x30] sm:$0xff]  ;;  %v100_v23 = vld [vmem:[%s314_s3 + $0xb8] sm:$0xff] }
   0x9   :  { %v82_v24 = vld [vmem:[%s314_s3 + $0x28] sm:$0xff]  ;;  %v99_v25 = vld [vmem:[%s314_s3 + $0xb0] sm:$0xff]  ;;  %v81_v26 = vld [vmem:[%s314_s3 + $0x20] sm:$0xff] }
   0xa   :  { %116 = vmatpush.msra.mxu2 %v89_v10  ;;  %135 = vmatpush.msra.mxu3 %v106_v11  ;;  %v98_v27 = vld [vmem:[%s314_s3 + $0xa8] sm:$0xff]  ;;  %v80_v28 = vld [vmem:[%s314_s3 + $0x18] sm:$0xff]  ;;  %v97_v29 = vld [vmem:[%s314_s3 + $0xa0] sm:$0xff] }
   0xb   :  { %v79_v30 = vld [vmem:[%s314_s3 + $0x10] sm:$0xff]  ;;  %v96_v31 = vld [vmem:[%s314_s3 + $0x98] sm:$0xff]  ;;  %v78_v32 = vld [vmem:[%s314_s3 + $0x8] sm:$0xff] }
   0xc   :  { %117 = vmatpush.msra.mxu2 %v88_v12  ;;  %136 = vmatpush.msra.mxu3 %v105_v13  ;;  %v95_v33 = vld [vmem:[%s314_s3 + $0x90] sm:$0xff]  ;;  %v77_v34 = vld [vmem:[%s314_s3] sm:$0xff]  ;;  %v94_v35 = vld [vmem:[%s314_s3 + $0x88] sm:$0xff] }
   0xd   :  { %v93_v36 = vld [vmem:[%s314_s3 + $0x80] sm:$0xff] }
   0xe   :  { %118 = vmatpush.msra.mxu2 %v87_v14  ;;  %137 = vmatpush.msra.mxu3 %v104_v15  ;;  %v25_v37 = vld [vmem:[%s316_s2] sm:$0x3] }
   0xf   :  { %v27_v38 = vperm.slane %v25_v37, 0  ;;  %v28_v39 = vperm.slane %v25_v37, 1  ;;  %v161_v46 = vld [vmem:[%s315_s4] ss:$0 sm:$0xff] }
  0x10   :  { %119 = vmatpush.msra.mxu2 %v86_v16  ;;  %138 = vmatpush.msra.mxu3 %v103_v17 }
  0x12   :  { %120 = vmatpush.msra.mxu2 %v85_v18  ;;  %139 = vmatpush.msra.mxu3 %v102_v19 }
  0x14   :  { %121 = vmatpush.msra.mxu2 %v84_v20  ;;  %140 = vmatpush.msra.mxu3 %v101_v21 }
  0x16   :  { %122 = vmatpush.msra.mxu2 %v83_v22  ;;  %141 = vmatpush.msra.mxu3 %v100_v23 }
  0x18   :  { %123 = vmatpush.msra.mxu2 %v82_v24  ;;  %142 = vmatpush.msra.mxu3 %v99_v25 }
  0x1a   :  { %124 = vmatpush.msra.mxu2 %v81_v26  ;;  %143 = vmatpush.msra.mxu3 %v98_v27 }
  0x1c   :  { %125 = vmatpush.msra.mxu2 %v80_v28  ;;  %144 = vmatpush.msra.mxu3 %v97_v29 }
  0x1e   :  { %126 = vmatpush.msra.mxu2 %v79_v30  ;;  %145 = vmatpush.msra.mxu3 %v96_v31 }
  0x20   :  { %127 = vmatpush.msra.mxu2 %v78_v32  ;;  %146 = vmatpush.msra.mxu3 %v95_v33 }
  0x22   :  { %128 = vmatpush.msra.mxu2 %v77_v34  ;;  %147 = vmatpush.msra.mxu3 %v94_v35 }
  0x24   :  { %148 = vmatpush.msra.mxu3 %v93_v36 }
  0x82   :  { %v52_v40 = vpop.f32.mrf.mxu0  ;;  %v72_v41 = vpop.f32.mrf.mxu1 }
  0x83   :  { %v53_v42 = vadd.f32 %v52_v40, %v27_v38  ;;  %v73_v43 = vadd.f32 %v72_v41, %v28_v39 }
  0x85   :  { %v75_v44 = vmax.f32 %v53_v42, 0.0  ;;  %v76_v45 = vmax.f32 %v73_v43, 0.0 }
  0x87   :  { %129 = vmatmul.f32.vlgmr.msra.gmra.mxu2 %v75_v44  ;;  %149 = vmatmul.f32.vlgmr.msra.gmra.mxu3 %v76_v45 }
 0x10a   :  { %v130_v47 = vpop.f32.mrf.mxu2  ;;  %v150_v48 = vpop.f32.mrf.mxu3 }
 0x10b   :  { %v131_v49 = vadd.f32 %v161_v46, %v130_v47 }
 0x10d   :  { %v151_v50 = vadd.f32 %v150_v48, %v131_v49 }
 0x10f   :  { %154 = vst.msk [vmem:[%s317_s5] sm:$0xff] %vm153_vm1, %v151_v50 }

</bundles_post_ra>
